<compile_context>
chip_gen: v5e
topology: v5e:2x2
jax: 0.10.0
libtpu: 0.0.40
codegen_flags: <defaults>
</compile_context>

<pallas_src>
import functools

import jax
import jax.numpy as jnp
from jax.experimental import pallas as pl
from jax.experimental.pallas import tpu as pltpu

LRELU_SLOPE = 0.2
BN_EPS = 1e-5
K1_PAD = 16                      # conv1 K (=9) zero-padded to 16 so the 4-row pack is 64 wide
ROWPACK1 = 4                     # conv1: 4 patch rows per kernel row  -> 128-lane output
ROWPACK2 = 2                     # conv2: 2 patch rows per kernel row  -> 128-lane output
TILE_ROWS = 1024                 # packed-row tile (= 4096 / 2048 real rows for conv1/conv2)
VMEM_LIMIT = 32 * 1024 * 1024    # well above the ~3 MiB working set; safe on all gens


def _tile(m, target=TILE_ROWS):
    # Whole array if it fits one tile (full-dim blocks are always legal), else a fixed
    # multiple-of-16 tile; partial last tiles are masked / clipped in-kernel.
    return m if m <= target else target


def _compiler_params():
    return pltpu.CompilerParams(dimension_semantics=("parallel",),
                                vmem_limit_bytes=VMEM_LIMIT)


def _block_diag(w, copies):
    # [[W,0,...],[0,W,...],...]: lets one MXU matmul produce `copies` consecutive patch
    # rows side-by-side in a single 128-lane output row (same HBM linear layout).
    k, c = w.shape
    out = jnp.zeros((k * copies, c * copies), w.dtype)
    for i in range(copies):
        out = out.at[i * k:(i + 1) * k, i * c:(i + 1) * c].set(w)
    return out


# ---------------- Pallas kernels ----------------

def conv1_kernel(p_ref, w_ref, b_ref, o_ref):
    # bf16 MXU matmul (4-row packed LHS x block-diag RHS), f32 epilogue (bias + LeakyReLU),
    # lane-dense (tm, 128) bf16 store.
    y = jnp.dot(p_ref[...], w_ref[...], preferred_element_type=jnp.float32)
    y = y + b_ref[...]
    y = jnp.where(y > 0, y, LRELU_SLOPE * y)
    o_ref[...] = y.astype(o_ref.dtype)


def conv2_stats_kernel(p_ref, w_ref, b_ref, z_ref, s_ref, ss_ref, *, tmp, m_total):
    # bf16 MXU matmul (2-row packed LHS x block-diag RHS) + bias in f32, lane-dense bf16
    # store of the pre-BN activations, plus masked per-tile (sum, sum-of-squares) partial
    # statistics taken from the f32 accumulator (bf16 storage does not touch the stats).
    i = pl.program_id(0)
    y = jnp.dot(p_ref[...], w_ref[...], preferred_element_type=jnp.float32)
    y = y + b_ref[...]
    z_ref[...] = y.astype(z_ref.dtype)

    # Packed row r holds real patch rows 2r (cols 0:64) and 2r+1 (cols 64:128).
    row = i * tmp + jax.lax.broadcasted_iota(jnp.int32, (tmp, 1), 0)
    y0 = jnp.where(2 * row < m_total, y[:, :64], 0.0)
    y1 = jnp.where(2 * row + 1 < m_total, y[:, 64:], 0.0)
    s_ref[0] = jnp.sum(y0, axis=0, keepdims=True) + jnp.sum(y1, axis=0, keepdims=True)
    ss_ref[0] = (jnp.sum(y0 * y0, axis=0, keepdims=True)
                 + jnp.sum(y1 * y1, axis=0, keepdims=True))


def bn_lrelu_fc_kernel(z_ref, w_ref, scale_ref, shift_ref, b_ref, o_ref):
    # Batch tile: BN folded into a per-feature affine (scale, shift) + LeakyReLU, fused
    # with the Linear(feat, 1) reduction against the NHWC-flatten-ordered FC weight.
    y = z_ref[...].astype(jnp.float32) * scale_ref[...] + shift_ref[...]   # (BT, feat)
    y = jnp.where(y > 0, y, LRELU_SLOPE * y)
    o_ref[...] = jnp.sum(y * w_ref[...], axis=1, keepdims=True) + b_ref[...]


# ---------------- JAX glue ----------------

def im2col(x_nhwc, ksize=3, stride=2, pad=1, k_pad_to=None):
    n, h, w, c = x_nhwc.shape
    xp = jnp.pad(x_nhwc, ((0, 0), (pad, pad), (pad, pad), (0, 0)))
    ho = (h + 2 * pad - ksize) // stride + 1
    wo = (w + 2 * pad - ksize) // stride + 1
    taps = []
    for ky in range(ksize):
        for kx in range(ksize):
            taps.append(xp[:, ky:ky + stride * ho:stride, kx:kx + stride * wo:stride, :])
    # tap index last -> flattened patch column order is (cin, ky, kx), matching a PyTorch
    # (Cout, Cin, KH, KW) weight reshaped to (Cin*KH*KW, Cout).
    t = jnp.stack(taps, axis=-1)                               # (N, Ho, Wo, C, KH*KW)
    patches = t.reshape(n * ho * wo, c * ksize * ksize)
    if k_pad_to is not None and k_pad_to > patches.shape[1]:
        patches = jnp.pad(patches, ((0, 0), (0, k_pad_to - patches.shape[1])))
    return patches, (n, ho, wo)


def init_params(key, image_size):
    ks = jax.random.split(key, 6)
    feat = 64 * (image_size // 4) * (image_size // 4)
    return dict(
        w1=jax.random.normal(ks[0], (1 * 3 * 3, 32), jnp.float32) * 0.2,
        b1=jax.random.normal(ks[1], (1, 32), jnp.float32) * 0.1,
        w2=jax.random.normal(ks[2], (32 * 3 * 3, 64), jnp.float32) * 0.05,
        b2=jax.random.normal(ks[3], (1, 64), jnp.float32) * 0.1,
        gamma=jnp.ones((1, 64), jnp.float32),    # BatchNorm2d default weight
        beta=jnp.zeros((1, 64), jnp.float32),    # BatchNorm2d default bias
        w_fc=jax.random.normal(ks[4], (1, feat), jnp.float32) * 0.02,
        b_fc=jax.random.normal(ks[5], (1, 1), jnp.float32) * 0.1,
    )


def discriminator_forward(x_nchw, params, image_size):
    n = x_nchw.shape[0]
    h2 = image_size // 4
    p_spatial = h2 * h2
    feat = 64 * p_spatial

    x = jnp.transpose(x_nchw, (0, 2, 3, 1)).astype(jnp.bfloat16)   # NCHW -> NHWC, bf16

    # -------- conv1 (1 -> 32, k3 s2 p1) + LeakyReLU, 4-row packed / lane-dense --------
    p1, (_, h1, w1sp) = im2col(x, k_pad_to=K1_PAD)                 # (M1, 16) bf16
    m1 = p1.shape[0]
    pad1 = (-m1) % ROWPACK1
    if pad1:
        p1 = jnp.pad(p1, ((0, pad1), (0, 0)))
    m1p = m1 + pad1
    p1r = p1.reshape(m1p // ROWPACK1, ROWPACK1 * K1_PAD)           # (M1/4, 64), same layout

    w1p = jnp.pad(params["w1"], ((0, K1_PAD - params["w1"].shape[0]), (0, 0)))
    w1bd = _block_diag(w1p, ROWPACK1).astype(jnp.bfloat16)         # (64, 128)
    b1t = jnp.tile(params["b1"], (1, ROWPACK1))                    # (1, 128) f32

    mrows1 = m1p // ROWPACK1
    t1 = _tile(mrows1)
    y1b = pl.pallas_call(
        conv1_kernel,
        out_shape=jax.ShapeDtypeStruct((mrows1, 32 * ROWPACK1), jnp.bfloat16),
        grid_spec=pltpu.PrefetchScalarGridSpec(
            num_scalar_prefetch=0,
            grid=(pl.cdiv(mrows1, t1),),
            in_specs=[pl.BlockSpec((t1, ROWPACK1 * K1_PAD), lambda i: (i, 0)),
                      pl.BlockSpec((ROWPACK1 * K1_PAD, 32 * ROWPACK1), lambda i: (0, 0)),
                      pl.BlockSpec((1, 32 * ROWPACK1), lambda i: (0, 0))],
            out_specs=pl.BlockSpec((t1, 32 * ROWPACK1), lambda i: (i, 0)),
        ),
        compiler_params=_compiler_params(),
    )(p1r, w1bd, b1t)
    y1 = y1b.reshape(m1p, 32)[:m1].reshape(n, h1, w1sp, 32)        # bf16

    # -------- conv2 (32 -> 64, k3 s2 p1): packed matmul + bias + partial BN stats --------
    p2, _ = im2col(y1)                                             # (M2, 288) bf16
    m2 = p2.shape[0]
    pad2 = (-m2) % ROWPACK2
    if pad2:
        p2 = jnp.pad(p2, ((0, pad2), (0, 0)))
    m2p = m2 + pad2
    p2r = p2.reshape(m2p // ROWPACK2, ROWPACK2 * 288)              # (M2/2, 576)

    w2bd = _block_diag(params["w2"], ROWPACK2).astype(jnp.bfloat16)  # (576, 128)
    b2t = jnp.tile(params["b2"], (1, ROWPACK2))                      # (1, 128) f32

    mrows2 = m2p // ROWPACK2
    t2 = _tile(mrows2)
    g2 = pl.cdiv(mrows2, t2)
    z, s_part, ss_part = pl.pallas_call(
        functools.partial(conv2_stats_kernel, tmp=t2, m_total=m2),
        out_shape=(jax.ShapeDtypeStruct((mrows2, 64 * ROWPACK2), jnp.bfloat16),
                   jax.ShapeDtypeStruct((g2, 1, 64), jnp.float32),
                   jax.ShapeDtypeStruct((g2, 1, 64), jnp.float32)),
        grid_spec=pltpu.PrefetchScalarGridSpec(
            num_scalar_prefetch=0,
            grid=(g2,),
            in_specs=[pl.BlockSpec((t2, ROWPACK2 * 288), lambda i: (i, 0)),
                      pl.BlockSpec((ROWPACK2 * 288, 64 * ROWPACK2), lambda i: (0, 0)),
                      pl.BlockSpec((1, 64 * ROWPACK2), lambda i: (0, 0))],
            out_specs=(pl.BlockSpec((t2, 64 * ROWPACK2), lambda i: (i, 0)),
                       pl.BlockSpec((1, 1, 64), lambda i: (i, 0, 0)),
                       pl.BlockSpec((1, 1, 64), lambda i: (i, 0, 0))),
        ),
        compiler_params=_compiler_params(),
    )(p2r, w2bd, b2t)

    # -------- fold global batch stats (biased var, PyTorch training BN) into an affine --------
    # NOTE: E[x^2]-E[x]^2 in f32 can cancel when |mean| >> std; clamped at 0 (fine here).
    s_all = jnp.sum(s_part, axis=(0, 1))                            # (64,)
    sq_all = jnp.sum(ss_part, axis=(0, 1))
    mean = s_all / m2
    var = jnp.maximum(sq_all / m2 - mean * mean, 0.0)
    inv = jax.lax.rsqrt(var + BN_EPS)
    scale_c = params["gamma"].reshape(-1) * inv                     # (64,)
    shift_c = params["beta"].reshape(-1) - mean * scale_c           # (64,)

    # Flatten everything to NHWC order (position-major, channel-minor): index = p*64 + c.
    scale_flat = jnp.tile(scale_c.reshape(1, 64), (1, p_spatial))   # (1, feat)
    shift_flat = jnp.tile(shift_c.reshape(1, 64), (1, p_spatial))   # (1, feat)
    # FC weight: PyTorch flatten order is (c, h, w) -> permute once to (p, c) flat order.
    w_flat = params["w_fc"].reshape(64, p_spatial).T.reshape(1, feat)

    # -------- BN affine + LeakyReLU + Linear(feat, 1), fused and batch-tiled --------
    z_flat = z.reshape(m2p, 64)[:m2].reshape(n, feat)               # bf16, lane-dense
    bt = n if n <= 16 else 16
    out = pl.pallas_call(
        bn_lrelu_fc_kernel,
        out_shape=jax.ShapeDtypeStruct((n, 1), jnp.float32),
        grid_spec=pltpu.PrefetchScalarGridSpec(
            num_scalar_prefetch=0,
            grid=(pl.cdiv(n, bt),),
            in_specs=[pl.BlockSpec((bt, feat), lambda i: (i, 0)),
                      pl.BlockSpec((1, feat), lambda i: (0, 0)),
                      pl.BlockSpec((1, feat), lambda i: (0, 0)),
                      pl.BlockSpec((1, feat), lambda i: (0, 0)),
                      pl.BlockSpec((1, 1), lambda i: (0, 0))],
            out_specs=pl.BlockSpec((bt, 1), lambda i: (i, 0)),
        ),
        compiler_params=_compiler_params(),
    )(z_flat, w_flat, scale_flat, shift_flat, params["b_fc"])
    return out


def reference_forward(x_nchw, params):
    # Pure-JAX f32 reference mirroring the PyTorch module (training-mode BatchNorm).
    x = jnp.transpose(x_nchw, (0, 2, 3, 1))
    p1, (n, h1, w1sp) = im2col(x)
    y1 = p1 @ params["w1"] + params["b1"]
    y1 = jnp.where(y1 > 0, y1, LRELU_SLOPE * y1)
    y1 = y1.reshape(n, h1, w1sp, 32)
    p2, (_, h2, w2sp) = im2col(y1)
    z = p2 @ params["w2"] + params["b2"]
    mean = jnp.mean(z, axis=0, keepdims=True)
    var = jnp.mean((z - mean) ** 2, axis=0, keepdims=True)
    y2 = (z - mean) * jax.lax.rsqrt(var + BN_EPS) * params["gamma"] + params["beta"]
    y2 = jnp.where(y2 > 0, y2, LRELU_SLOPE * y2)
    y2 = y2.reshape(n, h2, w2sp, 64)
    flat = jnp.transpose(y2, (0, 3, 1, 2)).reshape(n, -1)
    return flat @ params["w_fc"].T + params["b_fc"]


if __name__ == "__main__":
    key = jax.random.PRNGKey(0)
    # Small primary case plus the module's default image_size=28 (odd spatial tiles,
    # odd batch) to exercise the row-pack padding and permutation logic.
    for image_size, batch in ((16, 2), (28, 3)):
        k_x, k_p = jax.random.split(jax.random.fold_in(key, image_size))
        x = jax.random.normal(k_x, (batch, 1, image_size, image_size), jnp.float32)
        params = init_params(k_p, image_size)

        fwd = jax.jit(functools.partial(discriminator_forward, image_size=image_size))
        out = jax.block_until_ready(fwd(x, params))
        assert out.shape == (batch, 1), out.shape
        assert bool(jnp.all(jnp.isfinite(out)))

        ref = reference_forward(x, params)
        # bf16 MXU/activation path vs f32 reference: measured error is ~1e-2 absolute.
        assert jnp.allclose(out, ref, atol=5e-2, rtol=5e-2), (image_size, out, ref)
    print("KERNEL_OK")
</pallas_src>

<mosaic_0001>
module attributes {stable_mosaic.version = 11 : i64} {
  func.func @conv1_kernel(%arg0: i32, %arg1: memref<32x64xbf16, #tpu.memory_space<vmem>>, %arg2: memref<64x128xbf16, #tpu.memory_space<vmem>>, %arg3: memref<1x128xf32, #tpu.memory_space<vmem>>, %arg4: memref<32x128xbf16, #tpu.memory_space<vmem>>) attributes {dimension_semantics = [#tpu.dimension_semantics<parallel>], iteration_bounds = array<i64: 1>, scalar_prefetch = 0 : i64, scratch_operands = 0 : i64, tpu.core_type = #tpu.core_type<tc>, window_params = [{transform_indices = @transform_0, window_bounds = array<i64: 32, 64>}, {pipeline_mode = #tpu.pipeline_mode<synchronous>, transform_indices = @transform_1, window_bounds = array<i64: 64, 128>}, {pipeline_mode = #tpu.pipeline_mode<synchronous>, transform_indices = @transform_2, window_bounds = array<i64: 1, 128>}, {transform_indices = @transform_3, window_bounds = array<i64: 32, 128>}]} {
    %c0 = arith.constant 0 : index
    %c0_0 = arith.constant 0 : index
    %0 = vector.load %arg1[%c0, %c0_0] : memref<32x64xbf16, #tpu.memory_space<vmem>>, vector<32x64xbf16>
    %c0_1 = arith.constant 0 : index
    %c0_2 = arith.constant 0 : index
    %1 = vector.load %arg2[%c0_1, %c0_2] : memref<64x128xbf16, #tpu.memory_space<vmem>>, vector<64x128xbf16>
    %cst = arith.constant dense<0.000000e+00> : vector<32x128xf32>
    %2 = tpu.matmul %0, %1, %cst {dimension_numbers = #tpu.dot_dimension_numbers<[1], [0], [0], [1], [0, 0, 1, 1], [], []>} : vector<32x64xbf16>, vector<64x128xbf16>, vector<32x128xf32> -> vector<32x128xf32>
    %c0_3 = arith.constant 0 : index
    %c0_4 = arith.constant 0 : index
    %3 = vector.load %arg3[%c0_3, %c0_4] : memref<1x128xf32, #tpu.memory_space<vmem>>, vector<1x128xf32>
    %4 = vector.broadcast %3 : vector<1x128xf32> to vector<32x128xf32>
    %5 = arith.addf %2, %4 : vector<32x128xf32>
    %cst_5 = arith.constant 0.000000e+00 : f32
    %6 = vector.broadcast %cst_5 : f32 to vector<32x128xf32>
    %7 = arith.cmpf ogt, %5, %6 : vector<32x128xf32>
    %cst_6 = arith.constant 2.000000e-01 : f32
    %8 = vector.broadcast %cst_6 : f32 to vector<32x128xf32>
    %9 = arith.mulf %8, %5 : vector<32x128xf32>
    %10 = arith.select %7, %5, %9 : vector<32x128xi1>, vector<32x128xf32>
    %11 = arith.truncf %10 : vector<32x128xf32> to vector<32x128xbf16>
    %c0_7 = arith.constant 0 : index
    %c0_8 = arith.constant 0 : index
    %12 = vector.load %arg4[%c0_7, %c0_8] : memref<32x128xbf16, #tpu.memory_space<vmem>>, vector<32x128xbf16>
    tpu.vector_store %arg4[%c0_7, %c0_8], %11 {strides = array<i32>} : memref<32x128xbf16, #tpu.memory_space<vmem>>, vector<32x128xbf16>,
    return
  }
  func.func @transform_0(%arg0: i32) -> (i32, i32) {
    %c0_i32 = arith.constant 0 : i32
    %c0_i32_0 = arith.constant 0 : i32
    return %arg0, %c0_i32 : i32, i32
  }
  func.func @transform_1(%arg0: i32) -> (i32, i32) {
    %c0_i32 = arith.constant 0 : i32
    %c0_i32_0 = arith.constant 0 : i32
    %c0_i32_1 = arith.constant 0 : i32
    return %c0_i32, %c0_i32_0 : i32, i32
  }
  func.func @transform_2(%arg0: i32) -> (i32, i32) {
    %c0_i32 = arith.constant 0 : i32
    %c0_i32_0 = arith.constant 0 : i32
    %c0_i32_1 = arith.constant 0 : i32
    return %c0_i32, %c0_i32_0 : i32, i32
  }
  func.func @transform_3(%arg0: i32) -> (i32, i32) {
    %c0_i32 = arith.constant 0 : i32
    %c0_i32_0 = arith.constant 0 : i32
    return %arg0, %c0_i32 : i32, i32
  }
}

module attributes {stable_mosaic.version = 11 : i64} {
  func.func @conv2_stats_kernel(%arg0: i32, %arg1: memref<16x576xbf16, #tpu.memory_space<vmem>>, %arg2: memref<576x128xbf16, #tpu.memory_space<vmem>>, %arg3: memref<1x128xf32, #tpu.memory_space<vmem>>, %arg4: memref<16x128xbf16, #tpu.memory_space<vmem>>, %arg5: memref<1x1x64xf32, #tpu.memory_space<vmem>>, %arg6: memref<1x1x64xf32, #tpu.memory_space<vmem>>) attributes {dimension_semantics = [#tpu.dimension_semantics<parallel>], iteration_bounds = array<i64: 1>, scalar_prefetch = 0 : i64, scratch_operands = 0 : i64, tpu.core_type = #tpu.core_type<tc>, window_params = [{transform_indices = @transform_0, window_bounds = array<i64: 16, 576>}, {pipeline_mode = #tpu.pipeline_mode<synchronous>, transform_indices = @transform_1, window_bounds = array<i64: 576, 128>}, {pipeline_mode = #tpu.pipeline_mode<synchronous>, transform_indices = @transform_2, window_bounds = array<i64: 1, 128>}, {transform_indices = @transform_3, window_bounds = array<i64: 16, 128>}, {transform_indices = @transform_4, window_bounds = array<i64: 1, 1, 64>}, {transform_indices = @transform_5, window_bounds = array<i64: 1, 1, 64>}]} {
    %c0 = arith.constant 0 : index
    %c0_0 = arith.constant 0 : index
    %0 = vector.load %arg1[%c0, %c0_0] : memref<16x576xbf16, #tpu.memory_space<vmem>>, vector<16x576xbf16>
    %c0_1 = arith.constant 0 : index
    %c0_2 = arith.constant 0 : index
    %1 = vector.load %arg2[%c0_1, %c0_2] : memref<576x128xbf16, #tpu.memory_space<vmem>>, vector<576x128xbf16>
    %cst = arith.constant dense<0.000000e+00> : vector<16x128xf32>
    %2 = tpu.matmul %0, %1, %cst {dimension_numbers = #tpu.dot_dimension_numbers<[1], [0], [0], [1], [0, 0, 1, 1], [], []>} : vector<16x576xbf16>, vector<576x128xbf16>, vector<16x128xf32> -> vector<16x128xf32>
    %c0_3 = arith.constant 0 : index
    %c0_4 = arith.constant 0 : index
    %3 = vector.load %arg3[%c0_3, %c0_4] : memref<1x128xf32, #tpu.memory_space<vmem>>, vector<1x128xf32>
    %4 = vector.broadcast %3 : vector<1x128xf32> to vector<16x128xf32>
    %5 = arith.addf %2, %4 : vector<16x128xf32>
    %6 = arith.truncf %5 : vector<16x128xf32> to vector<16x128xbf16>
    %c0_5 = arith.constant 0 : index
    %c0_6 = arith.constant 0 : index
    %7 = vector.load %arg4[%c0_5, %c0_6] : memref<16x128xbf16, #tpu.memory_space<vmem>>, vector<16x128xbf16>
    tpu.vector_store %arg4[%c0_5, %c0_6], %6 {strides = array<i32>} : memref<16x128xbf16, #tpu.memory_space<vmem>>, vector<16x128xbf16>,
    %c16_i32 = arith.constant 16 : i32
    %8 = arith.muli %arg0, %c16_i32 : i32
    %9 = tpu.iota {dimensions = array<i32: 0>} : vector<16x1xi32>
    %10 = vector.broadcast %8 : i32 to vector<16x1xi32>
    %11 = arith.addi %10, %9 : vector<16x1xi32>
    %c2_i32 = arith.constant 2 : i32
    %12 = vector.broadcast %c2_i32 : i32 to vector<16x1xi32>
    %13 = arith.muli %12, %11 : vector<16x1xi32>
    %c32_i32 = arith.constant 32 : i32
    %14 = vector.broadcast %c32_i32 : i32 to vector<16x1xi32>
    %15 = arith.cmpi slt, %13, %14 : vector<16x1xi32>
    %16 = vector.extract_strided_slice %5 {offsets = [0, 0], sizes = [16, 64], strides = [1, 1]} : vector<16x128xf32> to vector<16x64xf32>
    %cst_7 = arith.constant 0.000000e+00 : f32
    %17 = vector.shape_cast %15 : vector<16x1xi1> to vector<16x1xi1>
    %18 = vector.broadcast %17 : vector<16x1xi1> to vector<16x64xi1>
    %19 = vector.broadcast %cst_7 : f32 to vector<16x64xf32>
    %20 = arith.select %18, %16, %19 : vector<16x64xi1>, vector<16x64xf32>
    %c2_i32_8 = arith.constant 2 : i32
    %21 = vector.broadcast %c2_i32_8 : i32 to vector<16x1xi32>
    %22 = arith.muli %21, %11 : vector<16x1xi32>
    %c1_i32 = arith.constant 1 : i32
    %23 = vector.broadcast %c1_i32 : i32 to vector<16x1xi32>
    %24 = arith.addi %22, %23 : vector<16x1xi32>
    %c32_i32_9 = arith.constant 32 : i32
    %25 = vector.broadcast %c32_i32_9 : i32 to vector<16x1xi32>
    %26 = arith.cmpi slt, %24, %25 : vector<16x1xi32>
    %27 = vector.extract_strided_slice %5 {offsets = [0, 64], sizes = [16, 64], strides = [1, 1]} : vector<16x128xf32> to vector<16x64xf32>
    %cst_10 = arith.constant 0.000000e+00 : f32
    %28 = vector.shape_cast %26 : vector<16x1xi1> to vector<16x1xi1>
    %29 = vector.broadcast %28 : vector<16x1xi1> to vector<16x64xi1>
    %30 = vector.broadcast %cst_10 : f32 to vector<16x64xf32>
    %31 = arith.select %29, %27, %30 : vector<16x64xi1>, vector<16x64xf32>
    %cst_11 = arith.constant dense<0.000000e+00> : vector<64xf32>
    %32 = vector.multi_reduction <add>, %20, %cst_11 [0] : vector<16x64xf32> to vector<64xf32>
    %33 = vector.shape_cast %32 : vector<64xf32> to vector<1x64xf32>
    %cst_12 = arith.constant dense<0.000000e+00> : vector<64xf32>
    %34 = vector.multi_reduction <add>, %31, %cst_12 [0] : vector<16x64xf32> to vector<64xf32>
    %35 = vector.shape_cast %34 : vector<64xf32> to vector<1x64xf32>
    %36 = arith.addf %33, %35 : vector<1x64xf32>
    %c0_13 = arith.constant 0 : index
    %c0_14 = arith.constant 0 : index
    %c0_15 = arith.constant 0 : index
    %37 = vector.load %arg5[%c0_13, %c0_14, %c0_15] : memref<1x1x64xf32, #tpu.memory_space<vmem>>, vector<1x1x64xf32>
    %38 = vector.shape_cast %37 : vector<1x1x64xf32> to vector<1x64xf32>
    %39 = vector.shape_cast %36 : vector<1x64xf32> to vector<1x1x64xf32>
    tpu.vector_store %arg5[%c0_13, %c0_14, %c0_15], %39 {strides = array<i32>} : memref<1x1x64xf32, #tpu.memory_space<vmem>>, vector<1x1x64xf32>,
    %40 = arith.mulf %20, %20 : vector<16x64xf32>
    %cst_16 = arith.constant dense<0.000000e+00> : vector<64xf32>
    %41 = vector.multi_reduction <add>, %40, %cst_16 [0] : vector<16x64xf32> to vector<64xf32>
    %42 = vector.shape_cast %41 : vector<64xf32> to vector<1x64xf32>
    %43 = arith.mulf %31, %31 : vector<16x64xf32>
    %cst_17 = arith.constant dense<0.000000e+00> : vector<64xf32>
    %44 = vector.multi_reduction <add>, %43, %cst_17 [0] : vector<16x64xf32> to vector<64xf32>
    %45 = vector.shape_cast %44 : vector<64xf32> to vector<1x64xf32>
    %46 = arith.addf %42, %45 : vector<1x64xf32>
    %c0_18 = arith.constant 0 : index
    %c0_19 = arith.constant 0 : index
    %c0_20 = arith.constant 0 : index
    %47 = vector.load %arg6[%c0_18, %c0_19, %c0_20] : memref<1x1x64xf32, #tpu.memory_space<vmem>>, vector<1x1x64xf32>
    %48 = vector.shape_cast %47 : vector<1x1x64xf32> to vector<1x64xf32>
    %49 = vector.shape_cast %46 : vector<1x64xf32> to vector<1x1x64xf32>
    tpu.vector_store %arg6[%c0_18, %c0_19, %c0_20], %49 {strides = array<i32>} : memref<1x1x64xf32, #tpu.memory_space<vmem>>, vector<1x1x64xf32>,
    return
  }
  func.func @transform_0(%arg0: i32) -> (i32, i32) {
    %c0_i32 = arith.constant 0 : i32
    %c0_i32_0 = arith.constant 0 : i32
    return %arg0, %c0_i32 : i32, i32
  }
  func.func @transform_1(%arg0: i32) -> (i32, i32) {
    %c0_i32 = arith.constant 0 : i32
    %c0_i32_0 = arith.constant 0 : i32
    %c0_i32_1 = arith.constant 0 : i32
    return %c0_i32, %c0_i32_0 : i32, i32
  }
  func.func @transform_2(%arg0: i32) -> (i32, i32) {
    %c0_i32 = arith.constant 0 : i32
    %c0_i32_0 = arith.constant 0 : i32
    %c0_i32_1 = arith.constant 0 : i32
    return %c0_i32, %c0_i32_0 : i32, i32
  }
  func.func @transform_3(%arg0: i32) -> (i32, i32) {
    %c0_i32 = arith.constant 0 : i32
    %c0_i32_0 = arith.constant 0 : i32
    return %arg0, %c0_i32 : i32, i32
  }
  func.func @transform_4(%arg0: i32) -> (i32, i32, i32) {
    %c0_i32 = arith.constant 0 : i32
    %c0_i32_0 = arith.constant 0 : i32
    %c0_i32_1 = arith.constant 0 : i32
    return %arg0, %c0_i32, %c0_i32_0 : i32, i32, i32
  }
  func.func @transform_5(%arg0: i32) -> (i32, i32, i32) {
    %c0_i32 = arith.constant 0 : i32
    %c0_i32_0 = arith.constant 0 : i32
    %c0_i32_1 = arith.constant 0 : i32
    return %arg0, %c0_i32, %c0_i32_0 : i32, i32, i32
  }
}

module attributes {stable_mosaic.version = 11 : i64} {
  func.func @bn_lrelu_fc_kernel(%arg0: i32, %arg1: memref<2x1024xbf16, #tpu.memory_space<vmem>>, %arg2: memref<1x1024xf32, #tpu.memory_space<vmem>>, %arg3: memref<1x1024xf32, #tpu.memory_space<vmem>>, %arg4: memref<1x1024xf32, #tpu.memory_space<vmem>>, %arg5: memref<1x1xf32, #tpu.memory_space<vmem>>, %arg6: memref<2x1xf32, #tpu.memory_space<vmem>>) attributes {dimension_semantics = [#tpu.dimension_semantics<parallel>], iteration_bounds = array<i64: 1>, scalar_prefetch = 0 : i64, scratch_operands = 0 : i64, tpu.core_type = #tpu.core_type<tc>, window_params = [{transform_indices = @transform_0, window_bounds = array<i64: 2, 1024>}, {pipeline_mode = #tpu.pipeline_mode<synchronous>, transform_indices = @transform_1, window_bounds = array<i64: 1, 1024>}, {pipeline_mode = #tpu.pipeline_mode<synchronous>, transform_indices = @transform_2, window_bounds = array<i64: 1, 1024>}, {pipeline_mode = #tpu.pipeline_mode<synchronous>, transform_indices = @transform_3, window_bounds = array<i64: 1, 1024>}, {pipeline_mode = #tpu.pipeline_mode<synchronous>, transform_indices = @transform_4, window_bounds = array<i64: 1, 1>}, {transform_indices = @transform_5, window_bounds = array<i64: 2, 1>}]} {
    %c0 = arith.constant 0 : index
    %c0_0 = arith.constant 0 : index
    %0 = vector.load %arg1[%c0, %c0_0] : memref<2x1024xbf16, #tpu.memory_space<vmem>>, vector<2x1024xbf16>
    %1 = arith.extf %0 : vector<2x1024xbf16> to vector<2x1024xf32>
    %c0_1 = arith.constant 0 : index
    %c0_2 = arith.constant 0 : index
    %2 = vector.load %arg3[%c0_1, %c0_2] : memref<1x1024xf32, #tpu.memory_space<vmem>>, vector<1x1024xf32>
    %3 = vector.broadcast %2 : vector<1x1024xf32> to vector<2x1024xf32>
    %4 = arith.mulf %1, %3 : vector<2x1024xf32>
    %c0_3 = arith.constant 0 : index
    %c0_4 = arith.constant 0 : index
    %5 = vector.load %arg4[%c0_3, %c0_4] : memref<1x1024xf32, #tpu.memory_space<vmem>>, vector<1x1024xf32>
    %6 = vector.broadcast %5 : vector<1x1024xf32> to vector<2x1024xf32>
    %7 = arith.addf %4, %6 : vector<2x1024xf32>
    %cst = arith.constant 0.000000e+00 : f32
    %8 = vector.broadcast %cst : f32 to vector<2x1024xf32>
    %9 = arith.cmpf ogt, %7, %8 : vector<2x1024xf32>
    %cst_5 = arith.constant 2.000000e-01 : f32
    %10 = vector.broadcast %cst_5 : f32 to vector<2x1024xf32>
    %11 = arith.mulf %10, %7 : vector<2x1024xf32>
    %12 = arith.select %9, %7, %11 : vector<2x1024xi1>, vector<2x1024xf32>
    %c0_6 = arith.constant 0 : index
    %c0_7 = arith.constant 0 : index
    %13 = vector.load %arg2[%c0_6, %c0_7] : memref<1x1024xf32, #tpu.memory_space<vmem>>, vector<1x1024xf32>
    %14 = vector.broadcast %13 : vector<1x1024xf32> to vector<2x1024xf32>
    %15 = arith.mulf %12, %14 : vector<2x1024xf32>
    %cst_8 = arith.constant dense<0.000000e+00> : vector<2xf32>
    %16 = vector.multi_reduction <add>, %15, %cst_8 [1] : vector<2x1024xf32> to vector<2xf32>
    %17 = vector.shape_cast %16 : vector<2xf32> to vector<2x1xf32>
    %c0_9 = arith.constant 0 : index
    %c0_10 = arith.constant 0 : index
    %18 = vector.load %arg5[%c0_9, %c0_10] : memref<1x1xf32, #tpu.memory_space<vmem>>, vector<1x1xf32>
    %19 = vector.broadcast %18 : vector<1x1xf32> to vector<2x1xf32>
    %20 = arith.addf %17, %19 : vector<2x1xf32>
    %c0_11 = arith.constant 0 : index
    %c0_12 = arith.constant 0 : index
    %21 = vector.load %arg6[%c0_11, %c0_12] : memref<2x1xf32, #tpu.memory_space<vmem>>, vector<2x1xf32>
    tpu.vector_store %arg6[%c0_11, %c0_12], %20 {strides = array<i32>} : memref<2x1xf32, #tpu.memory_space<vmem>>, vector<2x1xf32>,
    return
  }
  func.func @transform_0(%arg0: i32) -> (i32, i32) {
    %c0_i32 = arith.constant 0 : i32
    %c0_i32_0 = arith.constant 0 : i32
    return %arg0, %c0_i32 : i32, i32
  }
  func.func @transform_1(%arg0: i32) -> (i32, i32) {
    %c0_i32 = arith.constant 0 : i32
    %c0_i32_0 = arith.constant 0 : i32
    %c0_i32_1 = arith.constant 0 : i32
    return %c0_i32, %c0_i32_0 : i32, i32
  }
  func.func @transform_2(%arg0: i32) -> (i32, i32) {
    %c0_i32 = arith.constant 0 : i32
    %c0_i32_0 = arith.constant 0 : i32
    %c0_i32_1 = arith.constant 0 : i32
    return %c0_i32, %c0_i32_0 : i32, i32
  }
  func.func @transform_3(%arg0: i32) -> (i32, i32) {
    %c0_i32 = arith.constant 0 : i32
    %c0_i32_0 = arith.constant 0 : i32
    %c0_i32_1 = arith.constant 0 : i32
    return %c0_i32, %c0_i32_0 : i32, i32
  }
  func.func @transform_4(%arg0: i32) -> (i32, i32) {
    %c0_i32 = arith.constant 0 : i32
    %c0_i32_0 = arith.constant 0 : i32
    %c0_i32_1 = arith.constant 0 : i32
    return %c0_i32, %c0_i32_0 : i32, i32
  }
  func.func @transform_5(%arg0: i32) -> (i32, i32) {
    %c0_i32 = arith.constant 0 : i32
    %c0_i32_0 = arith.constant 0 : i32
    return %arg0, %c0_i32 : i32, i32
  }
}

</mosaic_0001>

<bundles_post_ra>
// kernel: discriminator_forward.3
= control target key start
LH: loop header
LB: loop body
LE: loop exit
PB: predicated region body
PF: predicated region fallthrough
CT: control target
= control target key end

     0   :  { %vm65_vm0 = vcmask 523264   ;;  %s210_s1 = inlined_call_operand.vmem [shape: bf16[64,128], index: 1, kind: input, shape index: {}]   ;;  %s211_s2 = inlined_call_operand.vmem [shape: f32[1,128], index: 2, kind: input, shape index: {}]   ;;  %s212_s0 = inlined_call_operand.vmem [shape: bf16[32,64], index: 0, kind: input, shape index: {}]   ;;  %s213_s3 = inlined_call_operand.vmem [shape: bf16[32,128], index: 3, kind: output, shape index: {}]  }
   0x1   :  { %v146_v0 = vld [vmem:[%s210_s1 + $0x18] sm:$0xff]  ;;  %v145_v1 = vld [vmem:[%s210_s1 + $0x10] sm:$0xff]  ;;  %v144_v2 = vld [vmem:[%s210_s1 + $0x8] sm:$0xff] }
   0x2   :  { %76 = vmatpush.bf16.msra.mxu0 %v146_v0  ;;  %158 = vmatpush.bf16.msra.mxu1 %v146_v0  ;;  %v143_v3 = vld [vmem:[%s210_s1] sm:$0xff]  ;;  %v142_v5 = vld [vmem:[%s212_s0 + $0x8] sm:$0xff] }
   0x3   :  { %v141_v4 = vld [vmem:[%s212_s0] sm:$0xff] }
   0x4   :  { %v162_v8 = vld [vmem:[%s211_s2] ss:$0 sm:$0xff] }
   0x6   :  { %77 = vmatpush.bf16.msra.mxu0 %v145_v1  ;;  %159 = vmatpush.bf16.msra.mxu1 %v145_v1 }
   0xa   :  { %78 = vmatpush.bf16.msra.mxu0 %v144_v2  ;;  %160 = vmatpush.bf16.msra.mxu1 %v144_v2 }
   0xe   :  { %79 = vmatpush.bf16.msra.mxu0 %v143_v3  ;;  %161 = vmatpush.bf16.msra.mxu1 %v143_v3 }
  0x11   :  { %139 = vmatmul.msk.bf16.vlgmr.msra.gmra.mxu0 %vm65_vm0, %v141_v4  ;;  %140 = vmatmul.msk.bf16.vlgmr.msra.gmra.mxu1 %vm65_vm0, %v142_v5 }
  0x8e   :  { %v81_v6 = vpop.f32.mrf.mxu0  ;;  %v86_v7 = vpop.f32.mrf.mxu1 }
  0x8f   :  { %v82_v9 = vadd.f32 %v162_v8, %v81_v6  ;;  %v87_v10 = vadd.f32 %v162_v8, %v86_v7 }
  0x91   :  { %v95_v13 = vmul.f32 0.2, %v82_v9  ;;  %v97_v14 = vmul.f32 0.2, %v87_v10  ;;  %vm91_vm1 = vcmp.gt.f32.partialorder %v82_v9, 0.0  ;;  %vm93_vm2 = vcmp.gt.f32.partialorder %v87_v10, 0.0 }
  0x93   :  { %v99_v19 = vsel %vm91_vm1, %v82_v9, %v95_v13  ;;  %v101_v20 = vsel %vm93_vm2, %v87_v10, %v97_v14 }
  0x96   :  { %v83_v11 = vpop.f32.mrf.mxu0  ;;  %v88_v12 = vpop.f32.mrf.mxu1 }
  0x97   :  { %v84_v15 = vadd.f32 %v162_v8, %v83_v11  ;;  %v89_v16 = vadd.f32 %v162_v8, %v88_v12 }
  0x99   :  { %vm92_vm3 = vcmp.gt.f32.partialorder %v84_v15, 0.0  ;;  %v96_v17 = vmul.f32 0.2, %v84_v15  ;;  %vm94_vm4 = vcmp.gt.f32.partialorder %v89_v16, 0.0  ;;  %v98_v18 = vmul.f32 0.2, %v89_v16 }
  0x9b   :  { %v100_v21 = vsel %vm92_vm3, %v84_v15, %v96_v17  ;;  %v102_v22 = vsel %vm94_vm4, %v89_v16, %v98_v18 }
  0x9c   :  { %v150_v23 = vpack.c.bf16 %v100_v21, %v99_v19  ;;  %v155_v24 = vpack.c.bf16 %v102_v22, %v101_v20 }
  0x9e   :  { %151 = vst [vmem:[%s213_s3] sm:$0xff] %v150_v23  }
  0x9f   :  { %157 = vst [vmem:[%s213_s3 + $0x8] sm:$0xff] %v155_v24  }

// kernel: discriminator_forward.4
= control target key start
LH: loop header
LB: loop body
LE: loop exit
PB: predicated region body
PF: predicated region fallthrough
CT: control target
= control target key end

     0   :  { %vm341_vm0 = vcmask 523264   ;;  %v420_v54 = vlaneseq  ;;  %vm455_vm3 = vcmask 1048064   ;;  %vm470_vm6 = vcmask 516096   ;;  %s915_s1 = inlined_call_operand.vmem [shape: bf16[576,128], index: 1, kind: input, shape index: {}]   ;;  %s916_s2 = inlined_call_operand.vmem [shape: f32[1,128], index: 2, kind: input, shape index: {}]   ;;  %s917_s0 = inlined_call_operand.vmem [shape: bf16[16,576], index: 0, kind: input, shape index: {}]   ;;  %s918_s3 = inlined_call_operand.vmem [shape: bf16[16,128], index: 3, kind: output, shape index: {0}]   ;;  %s919_s4 = inlined_call_operand.vmem [shape: f32[1,1,64], index: 4, kind: output, shape index: {1}]   ;;  %s920_s5 = inlined_call_operand.vmem [shape: f32[1,1,64], index: 5, kind: output, shape index: {2}]  }
   0x1   :  { %v689_v0 = vld [vmem:[%s915_s1 + $0x38] sm:$0xff]  ;;  %v688_v4 = vld [vmem:[%s915_s1 + $0x30] sm:$0xff]  ;;  %v687_v8 = vld [vmem:[%s915_s1 + $0x28] sm:$0xff] }
   0x2   :  { %v705_v1 = vld [vmem:[%s915_s1 + $0xb8] sm:$0xff]  ;;  %345 = vmatpush.bf16.msra.mxu0 %v689_v0  ;;  %v704_v5 = vld [vmem:[%s915_s1 + $0xb0] sm:$0xff]  ;;  %v703_v9 = vld [vmem:[%s915_s1 + $0xa8] sm:$0xff]  ;;  %v421_v58 = vshrl.u32 %v420_v54, 7 }
   0x3   :  { %v713_v2 = vld [vmem:[%s915_s1 + $0xf8] sm:$0xff]  ;;  %373 = vmatpush.bf16.msra.mxu2 %v705_v1  ;;  %v712_v6 = vld [vmem:[%s915_s1 + $0xf0] sm:$0xff]  ;;  %v711_v10 = vld [vmem:[%s915_s1 + $0xe8] sm:$0xff] }
   0x4   :  { %v697_v3 = vld [vmem:[%s915_s1 + $0x78] sm:$0xff]  ;;  %387 = vmatpush.bf16.msra.mxu3 %v713_v2  ;;  %v696_v7 = vld [vmem:[%s915_s1 + $0x70] sm:$0xff]  ;;  %v695_v11 = vld [vmem:[%s915_s1 + $0x68] sm:$0xff]  ;;  %v426_v62 = vmul.u32 2, %v421_v58  ;;  %v422_v63 = vadd.s32 8, %v421_v58 }
   0x5   :  { %359 = vmatpush.bf16.msra.mxu1 %v697_v3  ;;  %v686_v12 = vld [vmem:[%s915_s1 + $0x20] sm:$0xff]  ;;  %v685_v16 = vld [vmem:[%s915_s1 + $0x18] sm:$0xff]  ;;  %v684_v20 = vld [vmem:[%s915_s1 + $0x10] sm:$0xff] }
   0x6   :  { %346 = vmatpush.bf16.msra.mxu0 %v688_v4  ;;  %v702_v13 = vld [vmem:[%s915_s1 + $0xa0] sm:$0xff]  ;;  %v701_v17 = vld [vmem:[%s915_s1 + $0x98] sm:$0xff]  ;;  %v700_v21 = vld [vmem:[%s915_s1 + $0x90] sm:$0xff]  ;;  %vm428_vm1 = vcmp.lt.s32.totalorder %v426_v62, 32 }
   0x7   :  { %374 = vmatpush.bf16.msra.mxu2 %v704_v5  ;;  %v710_v14 = vld [vmem:[%s915_s1 + $0xe0] sm:$0xff]  ;;  %v709_v18 = vld [vmem:[%s915_s1 + $0xd8] sm:$0xff]  ;;  %v708_v22 = vld [vmem:[%s915_s1 + $0xd0] sm:$0xff]  ;;  %v436_v5 = vadd.s32 1, %v426_v62 }
   0x8   :  { %388 = vmatpush.bf16.msra.mxu3 %v712_v6  ;;  %v694_v15 = vld [vmem:[%s915_s1 + $0x60] sm:$0xff]  ;;  %v693_v19 = vld [vmem:[%s915_s1 + $0x58] sm:$0xff]  ;;  %v692_v23 = vld [vmem:[%s915_s1 + $0x50] sm:$0xff]  ;;  %v427_v6 = vmul.u32 2, %v422_v63 }
   0x9   :  { %360 = vmatpush.bf16.msra.mxu1 %v696_v7  ;;  %v683_v24 = vld [vmem:[%s915_s1 + $0x8] sm:$0xff]  ;;  %v682_v28 = vld [vmem:[%s915_s1] sm:$0xff]  ;;  %v679_v33 = vld [vmem:[%s917_s0 + $0x10] sm:$0xf0]  ;;  %vm438_vm2 = vcmp.lt.s32.totalorder %v436_v5, 32 }
   0xa   :  { %347 = vmatpush.bf16.msra.mxu0 %v687_v8  ;;  %v699_v25 = vld [vmem:[%s915_s1 + $0x88] sm:$0xff]  ;;  %v698_v29 = vld [vmem:[%s915_s1 + $0x80] sm:$0xff]  ;;  %v680_v35 = vld [vmem:[%s917_s0 + $0x18] sm:$0xf0]  ;;  %vm429_vm4 = vcmp.lt.s32.totalorder %v427_v6, 32 }
   0xb   :  { %375 = vmatpush.bf16.msra.mxu2 %v703_v9  ;;  %v707_v26 = vld [vmem:[%s915_s1 + $0xc8] sm:$0xff]  ;;  %v706_v30 = vld [vmem:[%s915_s1 + $0xc0] sm:$0xff]  ;;  %v516_v39 = vld [vmem:[%s917_s0 + $0x14] sm:$0xf0] }
   0xc   :  { %389 = vmatpush.bf16.msra.mxu3 %v711_v10  ;;  %v691_v27 = vld [vmem:[%s915_s1 + $0x48] sm:$0xff]  ;;  %v690_v31 = vld [vmem:[%s915_s1 + $0x40] sm:$0xff]  ;;  %v717_v40 = vld [vmem:[%s915_s1 + $0x118] sm:$0xff] }
   0xd   :  { %361 = vmatpush.bf16.msra.mxu1 %v695_v11  ;;  %v514_v32 = vld [vmem:[%s917_s0] sm:$0xf]  ;;  %v522_v34 = vld [vmem:[%s917_s0 + $0x8] sm:$0xf]  ;;  %v678_v36 = vld [vmem:[%s917_s0 + $0xc] sm:$0xf] }
   0xe   :  { %348 = vmatpush.bf16.msra.mxu0 %v686_v12  ;;  %v524_v37 = vld [vmem:[%s917_s0 + $0x1c] sm:$0xf0]  ;;  %v677_v38 = vld [vmem:[%s917_s0 + $0x4] sm:$0xf]  ;;  %v515_v41 = vor.u32 %v679_v33, %v514_v32  ;;  %v523_v42 = vor.u32 %v680_v35, %v522_v34  ;;  %v716_v45 = vld [vmem:[%s915_s1 + $0x110] sm:$0xff]  ;;  %v437_v11 = vadd.s32 1, %v427_v6 }
   0xf   :  { %376 = vmatpush.bf16.msra.mxu2 %v702_v13  ;;  %v527_v43 = vor.u32 %v678_v36, %v524_v37  ;;  %v519_v44 = vor.u32 %v677_v38, %v516_v39  ;;  %v715_v46 = vld [vmem:[%s915_s1 + $0x108] sm:$0xff]  ;;  %v714_v47 = vld [vmem:[%s915_s1 + $0x100] sm:$0xff]  ;;  %v530_v48 = vld [vmem:[%s917_s0 + $0x10] sm:$0xf] }
  0x10   :  { %390 = vmatpush.bf16.msra.mxu3 %v710_v14  ;;  %v681_v49 = vld [vmem:[%s917_s0 + $0x20] sm:$0xf0]  ;;  %v724_v52 = vld [vmem:[%s916_s2] ss:$0 sm:$0xff]  ;;  %vm439_vm5 = vcmp.lt.s32.totalorder %v437_v11, 32  ;;  %s725_s2 = smov 64  }
  0x11   :  { %362 = vmatpush.bf16.msra.mxu1 %v694_v15  ;;  %v531_v50 = vor.u32 %v681_v49, %v530_v48 }
  0x12   :  { %349 = vmatpush.bf16.msra.mxu0 %v685_v16 }
  0x13   :  { %377 = vmatpush.bf16.msra.mxu2 %v701_v17 }
  0x14   :  { %391 = vmatpush.bf16.msra.mxu3 %v709_v18 }
  0x15   :  { %363 = vmatpush.bf16.msra.mxu1 %v693_v19 }
  0x16   :  { %350 = vmatpush.bf16.msra.mxu0 %v684_v20 }
  0x17   :  { %378 = vmatpush.bf16.msra.mxu2 %v700_v21 }
  0x18   :  { %392 = vmatpush.bf16.msra.mxu3 %v708_v22 }
  0x19   :  { %364 = vmatpush.bf16.msra.mxu1 %v692_v23 }
  0x1a   :  { %351 = vmatpush.bf16.msra.mxu0 %v683_v24 }
  0x1b   :  { %379 = vmatpush.bf16.msra.mxu2 %v699_v25 }
  0x1c   :  { %393 = vmatpush.bf16.msra.mxu3 %v707_v26 }
  0x1d   :  { %365 = vmatpush.bf16.msra.mxu1 %v691_v27 }
  0x1e   :  { %352 = vmatpush.bf16.msra.mxu0 %v682_v28 }
  0x1f   :  { %380 = vmatpush.bf16.msra.mxu2 %v698_v29 }
  0x20   :  { %394 = vmatpush.bf16.msra.mxu3 %v706_v30 }
  0x21   :  { %366 = vmatpush.bf16.msra.mxu1 %v690_v31  ;;  %353 = vmatmul.bf16.vlgmr.msra.gmra.mxu0 %v515_v41 }
  0x22   :  { %405 = vmatpush.bf16.msrb.mxu0 %v717_v40  ;;  %381 = vmatmul.bf16.vlgmr.msra.gmra.mxu2 %v523_v42 }
  0x23   :  { %395 = vmatmul.bf16.vlgmr.msra.gmra.mxu3 %v527_v43 }
  0x24   :  { %367 = vmatmul.bf16.vlgmr.msra.gmra.mxu1 %v519_v44 }
  0x26   :  { %406 = vmatpush.bf16.msrb.mxu0 %v716_v45 }
  0x2a   :  { %407 = vmatpush.bf16.msrb.mxu0 %v715_v46 }
  0x2e   :  { %408 = vmatpush.bf16.msrb.mxu0 %v714_v47 }
  0x31   :  { %676 = vmatmul.msk.bf16.vlgmr.msrb.gmra.mxu0 %vm341_vm0, %v531_v50 }
  0x9e   :  { %v354_v51 = vpop.f32.mrf.mxu0 }
  0x9f   :  { %v355_v55 = vadd.f32 %v724_v52, %v354_v51 }
  0xa1   :  { %v368_v53 = vpop.f32.mrf.mxu1 }
  0xa2   :  { %v369_v59 = vadd.f32 %v368_v53, %v355_v55 }
  0xa5   :  { %v382_v56 = vpop.f32.mrf.mxu2 }
  0xa6   :  { %v356_v57 = vpop.f32.mrf.mxu0  ;;  %v383_v60 = vadd.f32 %v382_v56, %v369_v59  ;;  %v396_v61 = vpop.f32.mrf.mxu3 }
  0xa7   :  { %v357_v0 = vadd.f32 %v724_v52, %v356_v57 }
  0xa8   :  { %v397_v2 = vadd.f32 %v396_v61, %v383_v60 }
  0xa9   :  { %v370_v1 = vpop.f32.mrf.mxu1 }
  0xaa   :  { %v371_v7 = vadd.f32 %v370_v1, %v357_v0 }
  0xad   :  { %v384_v3 = vpop.f32.mrf.mxu2 }
  0xae   :  { %v410_v4 = vpop.f32.mrf.mxu0  ;;  %v385_v9 = vadd.f32 %v384_v3, %v371_v7  ;;  %v398_v12 = vpop.f32.mrf.mxu3 }
  0xaf   :  { %v411_v8 = vadd.f32 %v410_v4, %v397_v2 }
  0xb0   :  { %v399_v13 = vadd.f32 %v398_v12, %v385_v9 }
  0xb1   :  { %v434_v10 = vsel %vm428_vm1, %v411_v8, 0.0  ;;  %v444_v14 = vsel %vm438_vm2, %v411_v8, 0.0 }
  0xb2   :  { %v446_v17 = vsel %vm341_vm0, %v434_v10, 0.0  ;;  %v472_v18 = vmul.f32 %v434_v10, %v434_v10  ;;  %v483_v19 = vmul.f32 %v444_v14, %v444_v14  ;;  %v456_v20 = vsel %vm455_vm3, %v444_v14, 0.0 }
  0xb4   :  { %v474_v30 = vsel %vm341_vm0, %v472_v18, 0.0  ;;  %v485_v31 = vsel %vm455_vm3, %v483_v19, 0.0 }
  0xb6   :  { %v412_v15 = vpop.f32.mrf.mxu0 }
  0xb7   :  { %v413_v16 = vadd.f32 %v412_v15, %v399_v13 }
  0xb9   :  { %v721_v21 = vpack.c.bf16 %v413_v16, %v411_v8  ;;  %v435_v22 = vsel %vm429_vm4, %v413_v16, 0.0  ;;  %v445_v23 = vsel %vm439_vm5, %v413_v16, 0.0 }
  0xba   :  { %v447_v24 = vsel %vm341_vm0, %v435_v22, 0.0  ;;  %v457_v25 = vsel %vm455_vm3, %v445_v23, 0.0  ;;  %v473_v26 = vmul.f32 %v435_v22, %v435_v22  ;;  %v484_v27 = vmul.f32 %v445_v23, %v445_v23 }
  0xbb   :  { %722 = vst [vmem:[%s918_s3] sm:$0xff] %v721_v21   ;;  %v448_v28 = vadd.f32 %v447_v24, %v446_v17  ;;  %v458_v29 = vadd.f32 %v457_v25, %v456_v20 }
  0xbc   :  { %v475_v32 = vsel %vm341_vm0, %v473_v26, 0.0  ;;  %v486_v33 = vsel %vm455_vm3, %v484_v27, 0.0 }
  0xbd   :  { %v487_v34 = vadd.f32 %v486_v33, %v485_v31  ;;  %v459_v35 = vrot.slane %v458_v29, 4  ;;  %v476_v36 = vadd.f32 %v475_v32, %v474_v30  ;;  %v449_v48 = vrot.slane %v448_v28, 4 }
  0xbf   :  { %v460_v37 = vadd.f32 %v459_v35, %v458_v29  ;;  %v488_v38 = vrot.slane %v487_v34, 4  ;;  %v450_v49 = vadd.f32 %v449_v48, %v448_v28  ;;  %v477_v51 = vrot.slane %v476_v36, 4 }
  0xc1   :  { %v461_v39 = vrot.slane %v460_v37, 2  ;;  %v489_v40 = vadd.f32 %v488_v38, %v487_v34  ;;  %v451_v50 = vrot.slane %v450_v49, 2  ;;  %v478_v53 = vadd.f32 %v477_v51, %v476_v36 }
  0xc3   :  { %v462_v41 = vadd.f32 %v461_v39, %v460_v37  ;;  %v490_v42 = vrot.slane %v489_v40, 2  ;;  %v452_v52 = vadd.f32 %v451_v50, %v450_v49  ;;  %v479_v55 = vrot.slane %v478_v53, 2 }
  0xc5   :  { %v463_v43 = vrot.slane %v462_v41, 1  ;;  %v491_v45 = vadd.f32 %v490_v42, %v489_v40  ;;  %v453_v54 = vrot.slane %v452_v52, 1  ;;  %v480_v57 = vadd.f32 %v479_v55, %v478_v53 }
  0xc7   :  { %v464_v44 = vadd.f32 %v463_v43, %v462_v41  ;;  %v492_v46 = vrot.slane %v491_v45, 1  ;;  %v454_v56 = vadd.f32 %v453_v54, %v452_v52  ;;  %v481_v60 = vrot.slane %v480_v57, 1 }
  0xc9   :  { %466 = vrot.lane.b32.xlu0 %v464_v44, %s725_s2  ;;  %v493_v47 = vadd.f32 %v492_v46, %v491_v45  ;;  %v482_v61 = vadd.f32 %v481_v60, %v480_v57 }
  0xd1   :  { %495 = vrot.lane.b32.xlu0 %v493_v47, %s725_s2 }
 0x13b   :  { %v467_v58 = vpop.permute.xlu0 %466 }
 0x13c   :  { %v469_v59 = vadd.f32 %v467_v58, %v454_v56 }
 0x13e   :  { %471 = vst.msk [vmem:[%s919_s4] sm:$0x1] %vm470_vm6, %v469_v59 }
 0x143   :  { %v496_v62 = vpop.permute.xlu0 %495 }
 0x144   :  { %v498_v63 = vadd.f32 %v496_v62, %v482_v61 }
 0x146   :  { %499 = vst.msk [vmem:[%s920_s5] sm:$0x1] %vm470_vm6, %v498_v63 }

// kernel: discriminator_forward.5
= control target key start
LH: loop header
LB: loop body
LE: loop exit
PB: predicated region body
PF: predicated region fallthrough
CT: control target
= control target key end

     0   :  { %vm41_vm0 = vcmask 1041408   ;;  %vm43_vm1 = vcmask 1045508   ;;  %vm45_vm2 = vcmask 1043456   ;;  %vm155_vm5 = vcmask 1024   ;;  %s236_s0 = inlined_call_operand.vmem [shape: bf16[2,1024], index: 0, kind: input, shape index: {}]   ;;  %s237_s2 = inlined_call_operand.vmem [shape: f32[1,1024], index: 2, kind: input, shape index: {}]   ;;  %s238_s3 = inlined_call_operand.vmem [shape: f32[1,1024], index: 3, kind: input, shape index: {}]   ;;  %s239_s1 = inlined_call_operand.vmem [shape: f32[1,1024], index: 1, kind: input, shape index: {}]   ;;  %s240_s4 = inlined_call_operand.<no memory space> [shape: f32[1,1], index: 4, kind: input, shape index: {}]   ;;  %s241_s5 = inlined_call_operand.vmem [shape: f32[2,1], index: 5, kind: output, shape index: {}]  }
   0x1   :  { %v22_v0 = vld [vmem:[%s236_s0] sm:$0xff] }
   0x2   :  { %v25_v1 = vld [vmem:[%s237_s2] sm:$0xff]  ;;  %v23_v2 = vunpack.c.l.bf16 %v22_v0  ;;  %v24_v3 = vunpack.c.h.bf16 %v22_v0 }
   0x3   :  { %v27_v4 = vperm.slane %v25_v1, 0  ;;  %v28_v5 = vperm.slane %v25_v1, 1  ;;  %v54_v6 = vld [vmem:[%s238_s3] sm:$0xff]  ;;  %v29_v7 = vperm.slane %v25_v1, 2  ;;  %v30_v8 = vperm.slane %v25_v1, 3 }
   0x4   :  { %v31_v9 = vperm.slane %v25_v1, 4  ;;  %v32_v10 = vperm.slane %v25_v1, 5  ;;  %v33_v11 = vperm.slane %v25_v1, 6  ;;  %v34_v12 = vperm.slane %v25_v1, 7  ;;  %v86_v35 = vld [vmem:[%s239_s1] sm:$0xff] }
   0x5   :  { %v35_v13 = vrot.slane %v28_v5, 6  ;;  %v56_v14 = vperm.slane %v54_v6, 0  ;;  %v36_v15 = vrot.slane %v29_v7, 4  ;;  %v37_v16 = vrot.slane %v30_v8, 2 }
   0x6   :  { %v38_v17 = vrot.slane %v32_v10, 6  ;;  %v57_v18 = vperm.slane %v54_v6, 1  ;;  %v39_v19 = vrot.slane %v33_v11, 4  ;;  %v40_v20 = vrot.slane %v34_v12, 2 }
   0x7   :  { %v42_v21 = vsel %vm41_vm0, %v27_v4, %v35_v13  ;;  %v58_v22 = vperm.slane %v54_v6, 2  ;;  %v44_v23 = vsel %vm43_vm1, %v36_v15, %v37_v16  ;;  %v59_v25 = vperm.slane %v54_v6, 3 }
   0x8   :  { %v47_v24 = vsel %vm41_vm0, %v31_v9, %v38_v17  ;;  %v60_v26 = vperm.slane %v54_v6, 4  ;;  %v46_v27 = vsel %vm45_vm2, %v42_v21, %v44_v23  ;;  %v48_v28 = vsel %vm43_vm1, %v39_v19, %v40_v20 }
   0x9   :  { %v61_v29 = vperm.slane %v54_v6, 5  ;;  %v62_v30 = vperm.slane %v54_v6, 6  ;;  %v49_v31 = vsel %vm45_vm2, %v47_v24, %v48_v28  ;;  %v52_v32 = vmul.f32 %v46_v27, %v23_v2 }
   0xa   :  { %v63_v33 = vperm.slane %v54_v6, 7  ;;  %v64_v34 = vrot.slane %v57_v18, 6  ;;  %v53_v36 = vmul.f32 %v49_v31, %v24_v3  ;;  %v65_v37 = vrot.slane %v58_v22, 4 }
   0xb   :  { %v66_v38 = vrot.slane %v59_v25, 2  ;;  %v67_v39 = vrot.slane %v61_v29, 6  ;;  %v68_v40 = vrot.slane %v62_v30, 4  ;;  %v88_v43 = vperm.slane %v86_v35, 0 }
   0xc   :  { %v69_v41 = vrot.slane %v63_v33, 2  ;;  %v70_v42 = vsel %vm41_vm0, %v56_v14, %v64_v34  ;;  %v89_v46 = vperm.slane %v86_v35, 1  ;;  %v90_v47 = vperm.slane %v86_v35, 2 }
   0xd   :  { %v71_v44 = vsel %vm43_vm1, %v65_v37, %v66_v38  ;;  %v73_v45 = vsel %vm41_vm0, %v60_v26, %v67_v39  ;;  %v91_v50 = vperm.slane %v86_v35, 3  ;;  %v92_v51 = vperm.slane %v86_v35, 4 }
   0xe   :  { %v72_v48 = vsel %vm45_vm2, %v70_v42, %v71_v44  ;;  %v74_v49 = vsel %vm43_vm1, %v68_v40, %v69_v41  ;;  %v93_v54 = vperm.slane %v86_v35, 5  ;;  %v94_v55 = vperm.slane %v86_v35, 6 }
   0xf   :  { %v75_v52 = vsel %vm45_vm2, %v73_v45, %v74_v49  ;;  %v78_v53 = vadd.f32 %v72_v48, %v52_v32  ;;  %v95_v57 = vperm.slane %v86_v35, 7  ;;  %v96_v58 = vrot.slane %v89_v46, 6 }
  0x10   :  { %v79_v56 = vadd.f32 %v75_v52, %v53_v36  ;;  %v97_v59 = vrot.slane %v90_v47, 4  ;;  %v98_v61 = vrot.slane %v91_v50, 2  ;;  %v99_v62 = vrot.slane %v93_v54, 6 }
  0x11   :  { %vm80_vm3 = vcmp.gt.f32.partialorder %v78_v53, 0.0  ;;  %v82_v60 = vmul.f32 0.2, %v78_v53  ;;  %v100_v0 = vrot.slane %v94_v55, 4  ;;  %v101_v1 = vrot.slane %v95_v57, 2 }
  0x12   :  { %vm81_vm4 = vcmp.gt.f32.partialorder %v79_v56, 0.0  ;;  %v83_v63 = vmul.f32 0.2, %v79_v56  ;;  %v102_v3 = vsel %vm41_vm0, %v88_v43, %v96_v58  ;;  %v103_v4 = vsel %vm43_vm1, %v97_v59, %v98_v61 }
  0x13   :  { %v84_v2 = vsel %vm80_vm3, %v78_v53, %v82_v60  ;;  %v105_v5 = vsel %vm41_vm0, %v92_v51, %v99_v62  ;;  %v104_v7 = vsel %vm45_vm2, %v102_v3, %v103_v4  ;;  %v106_v8 = vsel %vm43_vm1, %v100_v0, %v101_v1 }
  0x14   :  { %v85_v6 = vsel %vm81_vm4, %v79_v56, %v83_v63  ;;  %v10_v9 = vstv %s240_s4  ;;  %v107_v10 = vsel %vm45_vm2, %v105_v5, %v106_v8  ;;  %v110_v11 = vmul.f32 %v104_v7, %v84_v2 }
  0x15   :  { %11 = vst [vmem:[#allocation2] sm:$0x1] %v10_v9  ;;  %v111_v12 = vmul.f32 %v107_v10, %v85_v6 }
  0x16   :  { %114 = vst [vmem:[#allocation1] ss:$4 sm:$0xff] %v110_v11 }
  0x17   :  { %116 = vst [vmem:[#allocation1 + $0x20] ss:$4 sm:$0xff] %v111_v12 }
  0x1c   :  { %v161_v36 = vld [vmem:[#allocation2] ss:$0 sm:$0xff] }
  0x1d   :  { %v117_v13 = vld.sshfl [vmem:[#allocation1] sm:$0xff pattern:$0x73625140]  ;;  %v118_v14 = vld.sshfl [vmem:[#allocation1 + $0x8] sm:$0xff pattern:$0x73625140] }
  0x1e   :  { %v119_v15 = vld.sshfl [vmem:[#allocation1 + $0x10] sm:$0xff pattern:$0x73625140]  ;;  %v120_v16 = vld.sshfl [vmem:[#allocation1 + $0x18] sm:$0xff pattern:$0x73625140] }
  0x1f   :  { %v133_v17 = vsel %vm41_vm0, %v117_v13, 0.0  ;;  %v134_v18 = vsel %vm41_vm0, %v118_v14, 0.0  ;;  %v136_v19 = vsel %vm41_vm0, %v119_v15, 0.0  ;;  %v121_v20 = vld.sshfl [vmem:[#allocation1 + $0x20] sm:$0xff pattern:$0x73625140] }
  0x20   :  { %v135_v21 = vadd.f32 %v134_v18, %v133_v17  ;;  %v138_v22 = vsel %vm41_vm0, %v120_v16, 0.0  ;;  %v122_v23 = vld.sshfl [vmem:[#allocation1 + $0x28] sm:$0xff pattern:$0x73625140]  ;;  %v140_v25 = vsel %vm41_vm0, %v121_v20, 0.0 }
  0x21   :  { %v123_v26 = vld.sshfl [vmem:[#allocation1 + $0x30] sm:$0xff pattern:$0x73625140]  ;;  %v142_v28 = vsel %vm41_vm0, %v122_v23, 0.0 }
  0x22   :  { %v137_v24 = vadd.f32 %v136_v19, %v135_v21  ;;  %v124_v29 = vld.sshfl [vmem:[#allocation1 + $0x38] sm:$0xff pattern:$0x73625140]  ;;  %v144_v31 = vsel %vm41_vm0, %v123_v26, 0.0 }
  0x23   :  { %v146_v33 = vsel %vm41_vm0, %v124_v29, 0.0 }
  0x24   :  { %v139_v27 = vadd.f32 %v138_v22, %v137_v24 }
  0x26   :  { %v141_v30 = vadd.f32 %v140_v25, %v139_v27 }
  0x28   :  { %v143_v32 = vadd.f32 %v142_v28, %v141_v30 }
  0x2a   :  { %v145_v34 = vadd.f32 %v144_v31, %v143_v32 }
  0x2c   :  { %v147_v35 = vadd.f32 %v146_v33, %v145_v34 }
  0x2e   :  { %148 = vadd.xlane.f32.xlu0 %v147_v35 }
  0xa1   :  { %v149_v37 = vpop.xlane.xlu0 %148 }
  0xa2   :  { %v154_v38 = vadd.f32 %v161_v36, %v149_v37 }
  0xa4   :  { %156 = vst.msk [vmem:[%s241_s5] sm:$0x3] %vm155_vm5, %v154_v38 }

</bundles_post_ra>
